<compile_context>
chip_gen: v5e
topology: v5e:2x2
jax: 0.10.0
libtpu: 0.0.40
codegen_flags: <defaults>
</compile_context>

<pallas_src>
import jax
import jax.numpy as jnp
from jax.experimental import pallas as pl
from jax.experimental.pallas import tpu as pltpu

# ---- model dimensions (small, lane/sublane aligned) -------------------------
B = 8            # batch
C = 4            # patchtst input channels
L = 32           # patchtst sequence length  -> F1 = C * L = 128
F1 = C * L       # patchtst flattened feature dim
D1 = 128         # patchtst tower output dim
S = 8            # transformer sequence length
DM = 128         # transformer model dim
D2 = 128         # transformer tower output dim
F_TOT = F1 + DM  # fused contraction dim (256)
D_OUT = D1 + D2  # fused / concatenated output dim (256)

_GELU_C0 = 0.7978845608028654             # sqrt(2/pi)
_GELU_C1 = 0.7978845608028654 * 0.044715  # pre-fused scale (one fewer VPU mul)


def _round_up(x, m):
    return ((x + m - 1) // m) * m


def _gelu_tanh(x):
    # tanh goes to the EUP (separate bundle slot); surrounding muls are VPU.
    return 0.5 * x * (1.0 + jnp.tanh(x * (_GELU_C0 + _GELU_C1 * x * x)))


def dual_tower_kernel(x1_ref, src_ref, pos_ref, w_ref, b_ref, out_ref):
    # ---- Tower-2 pooling in f32 (the 1/S is folded into the fused weight) ---
    pooled = jnp.sum(src_ref[...] + pos_ref[...], axis=1)           # (bt, DM) f32

    # ---- single fused block-diagonal matmul on the MXU ----------------------
    # lanes [:D1]  <- tower-1 pre-activation (x1 @ w1)
    # lanes [D1:]  <- tower-2 pre-activation (mean-pooled @ w2)
    lhs = jnp.concatenate(
        [x1_ref[...].astype(jnp.bfloat16), pooled.astype(jnp.bfloat16)],
        axis=-1)                                                     # (bt, 256) bf16
    z = jnp.dot(lhs, w_ref[...], preferred_element_type=jnp.float32)
    z = z + b_ref[...]                                               # fused bias (f32)

    # ---- per-tower activations; two tile-aligned 128-lane stores ------------
    # (lane 128 is exactly a vreg boundary -> unmasked, lane-dense vst;
    #  writing the halves directly realizes torch.cat for free)
    out_ref[:, :D1] = _gelu_tanh(z[:, :D1]).astype(out_ref.dtype)    # GELU half
    out_ref[:, D1:] = jnp.maximum(z[:, D1:], 0.0).astype(out_ref.dtype)  # ReLU half


def dual_tower_forward(patchtst_input, transformer_input, params, *, batch_tile=None):
    """patchtst_input: (B, C, L); transformer_input: (src, pos), each (B, S, DM)."""
    src, pos = transformer_input
    w1, b1, w2, b2 = params
    b = patchtst_input.shape[0]

    # ---- wrapper-side parameter fusion (constant-foldable under jit) --------
    # block-diagonal weight [[w1, 0], [0, w2 / S]] -> one MXU op in the kernel,
    # with the mean-pool's 1/S folded in; bf16 for the MXU fast path.
    w_fused = jnp.zeros((F_TOT, D_OUT), jnp.float32)
    w_fused = w_fused.at[:F1, :D1].set(w1)
    w_fused = w_fused.at[F1:, D1:].set(w2 / S)
    w_fused = w_fused.astype(jnp.bfloat16)
    b_fused = jnp.concatenate([b1, b2], axis=-1)                     # (1, D_OUT) f32

    # flatten NCL -> (B, C*L); layout-preserving reshape only, no dtype cast
    # (casting to bf16 happens in-kernel so HBM activations are read once).
    x1 = patchtst_input.reshape(b, F1)

    # ---- batch tiling (scales to large batch; demo uses a single tile) ------
    if batch_tile is None:
        batch_tile = 256 if b >= 256 else _round_up(b, 8)
    bt = batch_tile
    b_pad = _round_up(b, bt)
    if b_pad != b:
        pad = b_pad - b
        x1 = jnp.pad(x1, ((0, pad), (0, 0)))
        src = jnp.pad(src, ((0, pad), (0, 0), (0, 0)))
        pos = jnp.pad(pos, ((0, pad), (0, 0), (0, 0)))
    grid = (b_pad // bt,)

    out = pl.pallas_call(
        dual_tower_kernel,
        out_shape=jax.ShapeDtypeStruct((b_pad, D_OUT), jnp.float32),
        grid_spec=pltpu.PrefetchScalarGridSpec(
            num_scalar_prefetch=0,
            grid=grid,
            in_specs=[
                pl.BlockSpec((bt, F1), lambda i: (i, 0)),            # x1 batch tile
                pl.BlockSpec((bt, S, DM), lambda i: (i, 0, 0)),      # src batch tile
                pl.BlockSpec((bt, S, DM), lambda i: (i, 0, 0)),      # pos batch tile
                pl.BlockSpec((F_TOT, D_OUT), lambda i: (0, 0)),      # fused weight (resident)
                pl.BlockSpec((1, D_OUT), lambda i: (0, 0)),          # fused bias (resident)
            ],
            out_specs=pl.BlockSpec((bt, D_OUT), lambda i: (i, 0)),
        ),
        compiler_params=pltpu.CompilerParams(
            # batch axis is independent -> shard across the 2 TCs on v7x
            dimension_semantics=("parallel",),
            vmem_limit_bytes=32 << 20,  # tiny footprint; safe on v7x's 64 MiB VMEM
        ),
    )(x1, src, pos, w_fused, b_fused)
    return out[:b]


def dual_tower_reference(patchtst_input, transformer_input, params):
    # Pure-JAX reference with the same rounding points as the kernel.
    src, pos = transformer_input
    w1, b1, w2, b2 = params
    b = patchtst_input.shape[0]
    x1 = patchtst_input.reshape(b, F1).astype(jnp.bfloat16)
    t1 = _gelu_tanh(jnp.dot(x1, w1.astype(jnp.bfloat16),
                            preferred_element_type=jnp.float32) + b1)
    pooled = jnp.sum(src + pos, axis=1).astype(jnp.bfloat16)
    t2 = jnp.maximum(jnp.dot(pooled, (w2 / S).astype(jnp.bfloat16),
                             preferred_element_type=jnp.float32) + b2, 0.0)
    return jnp.concatenate([t1, t2], axis=-1)


if __name__ == "__main__":
    key = jax.random.PRNGKey(0)
    k_x1, k_src, k_pos, k_w1, k_b1, k_w2, k_b2 = jax.random.split(key, 7)

    # deterministic synthetic inputs
    patchtst_input = jax.random.normal(k_x1, (B, C, L), dtype=jnp.float32)
    src = jax.random.normal(k_src, (B, S, DM), dtype=jnp.float32)
    pos = jax.random.normal(k_pos, (B, S, DM), dtype=jnp.float32)
    transformer_input = (src, pos)

    # deterministic synthetic parameters (both towers)
    w1 = jax.random.normal(k_w1, (F1, D1), dtype=jnp.float32) * (1.0 / jnp.sqrt(F1))
    b1 = jax.random.normal(k_b1, (1, D1), dtype=jnp.float32) * 0.02
    w2 = jax.random.normal(k_w2, (DM, D2), dtype=jnp.float32) * (1.0 / jnp.sqrt(DM))
    b2 = jax.random.normal(k_b2, (1, D2), dtype=jnp.float32) * 0.02
    params = (w1, b1, w2, b2)

    out = dual_tower_forward(patchtst_input, transformer_input, params)
    out = jax.block_until_ready(out)

    ref = dual_tower_reference(patchtst_input, transformer_input, params)
    assert out.shape == (B, D_OUT), out.shape
    assert jnp.allclose(out, ref, atol=2e-3, rtol=2e-3), float(jnp.max(jnp.abs(out - ref)))

    print("KERNEL_OK")
</pallas_src>

<mosaic_0001>
module attributes {stable_mosaic.version = 11 : i64} {
  func.func @dual_tower_kernel(%arg0: i32, %arg1: memref<8x128xf32, #tpu.memory_space<vmem>>, %arg2: memref<8x8x128xf32, #tpu.memory_space<vmem>>, %arg3: memref<8x8x128xf32, #tpu.memory_space<vmem>>, %arg4: memref<256x256xbf16, #tpu.memory_space<vmem>>, %arg5: memref<1x256xf32, #tpu.memory_space<vmem>>, %arg6: memref<8x256xf32, #tpu.memory_space<vmem>>) attributes {dimension_semantics = [#tpu.dimension_semantics<parallel>], iteration_bounds = array<i64: 1>, scalar_prefetch = 0 : i64, scratch_operands = 0 : i64, tpu.core_type = #tpu.core_type<tc>, window_params = [{transform_indices = @transform_0, window_bounds = array<i64: 8, 128>}, {transform_indices = @transform_1, window_bounds = array<i64: 8, 8, 128>}, {transform_indices = @transform_2, window_bounds = array<i64: 8, 8, 128>}, {pipeline_mode = #tpu.pipeline_mode<synchronous>, transform_indices = @transform_3, window_bounds = array<i64: 256, 256>}, {pipeline_mode = #tpu.pipeline_mode<synchronous>, transform_indices = @transform_4, window_bounds = array<i64: 1, 256>}, {transform_indices = @transform_5, window_bounds = array<i64: 8, 256>}]} {
    %c0 = arith.constant 0 : index
    %c0_0 = arith.constant 0 : index
    %c0_1 = arith.constant 0 : index
    %0 = vector.load %arg2[%c0, %c0_0, %c0_1] : memref<8x8x128xf32, #tpu.memory_space<vmem>>, vector<8x8x128xf32>
    %c0_2 = arith.constant 0 : index
    %c0_3 = arith.constant 0 : index
    %c0_4 = arith.constant 0 : index
    %1 = vector.load %arg3[%c0_2, %c0_3, %c0_4] : memref<8x8x128xf32, #tpu.memory_space<vmem>>, vector<8x8x128xf32>
    %2 = arith.addf %0, %1 : vector<8x8x128xf32>
    %cst = arith.constant dense<0.000000e+00> : vector<8x128xf32>
    %3 = vector.multi_reduction <add>, %2, %cst [1] : vector<8x8x128xf32> to vector<8x128xf32>
    %c0_5 = arith.constant 0 : index
    %c0_6 = arith.constant 0 : index
    %4 = vector.load %arg1[%c0_5, %c0_6] : memref<8x128xf32, #tpu.memory_space<vmem>>, vector<8x128xf32>
    %5 = arith.truncf %4 : vector<8x128xf32> to vector<8x128xbf16>
    %6 = arith.truncf %3 : vector<8x128xf32> to vector<8x128xbf16>
    %7 = tpu.concatenate %5, %6 in 1 : vector<8x128xbf16>, vector<8x128xbf16> -> vector<8x256xbf16>
    %c0_7 = arith.constant 0 : index
    %c0_8 = arith.constant 0 : index
    %8 = vector.load %arg4[%c0_7, %c0_8] : memref<256x256xbf16, #tpu.memory_space<vmem>>, vector<256x256xbf16>
    %cst_9 = arith.constant dense<0.000000e+00> : vector<8x256xf32>
    %9 = tpu.matmul %7, %8, %cst_9 {dimension_numbers = #tpu.dot_dimension_numbers<[1], [0], [0], [1], [0, 0, 1, 1], [], []>} : vector<8x256xbf16>, vector<256x256xbf16>, vector<8x256xf32> -> vector<8x256xf32>
    %c0_10 = arith.constant 0 : index
    %c0_11 = arith.constant 0 : index
    %10 = vector.load %arg5[%c0_10, %c0_11] : memref<1x256xf32, #tpu.memory_space<vmem>>, vector<1x256xf32>
    %11 = vector.broadcast %10 : vector<1x256xf32> to vector<8x256xf32>
    %12 = arith.addf %9, %11 : vector<8x256xf32>
    %13 = vector.extract_strided_slice %12 {offsets = [0, 0], sizes = [8, 128], strides = [1, 1]} : vector<8x256xf32> to vector<8x128xf32>
    %cst_12 = arith.constant 5.000000e-01 : f32
    %14 = vector.broadcast %cst_12 : f32 to vector<8x128xf32>
    %15 = arith.mulf %14, %13 : vector<8x128xf32>
    %cst_13 = arith.constant 0.0356774069 : f32
    %16 = vector.broadcast %cst_13 : f32 to vector<8x128xf32>
    %17 = arith.mulf %16, %13 : vector<8x128xf32>
    %18 = arith.mulf %17, %13 : vector<8x128xf32>
    %cst_14 = arith.constant 0.797884583 : f32
    %19 = vector.broadcast %cst_14 : f32 to vector<8x128xf32>
    %20 = arith.addf %19, %18 : vector<8x128xf32>
    %21 = arith.mulf %13, %20 : vector<8x128xf32>
    %22 = math.tanh %21 : vector<8x128xf32>
    %cst_15 = arith.constant 1.000000e+00 : f32
    %23 = vector.broadcast %cst_15 : f32 to vector<8x128xf32>
    %24 = arith.addf %23, %22 : vector<8x128xf32>
    %25 = arith.mulf %15, %24 : vector<8x128xf32>
    %c0_16 = arith.constant 0 : index
    %c0_17 = arith.constant 0 : index
    %26 = vector.load %arg6[%c0_16, %c0_17] : memref<8x256xf32, #tpu.memory_space<vmem>>, vector<8x128xf32>
    tpu.vector_store %arg6[%c0_16, %c0_17], %25 {strides = array<i32>} : memref<8x256xf32, #tpu.memory_space<vmem>>, vector<8x128xf32>,
    %27 = vector.extract_strided_slice %12 {offsets = [0, 128], sizes = [8, 128], strides = [1, 1]} : vector<8x256xf32> to vector<8x128xf32>
    %cst_18 = arith.constant 0.000000e+00 : f32
    %28 = vector.broadcast %cst_18 : f32 to vector<8x128xf32>
    %29 = arith.maximumf %27, %28 : vector<8x128xf32>
    %c0_19 = arith.constant 0 : index
    %c128 = arith.constant 128 : index
    %30 = vector.load %arg6[%c0_19, %c128] : memref<8x256xf32, #tpu.memory_space<vmem>>, vector<8x128xf32>
    tpu.vector_store %arg6[%c0_19, %c128], %29 {strides = array<i32>} : memref<8x256xf32, #tpu.memory_space<vmem>>, vector<8x128xf32>,
    return
  }
  func.func @transform_0(%arg0: i32) -> (i32, i32) {
    %c0_i32 = arith.constant 0 : i32
    %c0_i32_0 = arith.constant 0 : i32
    return %arg0, %c0_i32 : i32, i32
  }
  func.func @transform_1(%arg0: i32) -> (i32, i32, i32) {
    %c0_i32 = arith.constant 0 : i32
    %c0_i32_0 = arith.constant 0 : i32
    %c0_i32_1 = arith.constant 0 : i32
    return %arg0, %c0_i32, %c0_i32_0 : i32, i32, i32
  }
  func.func @transform_2(%arg0: i32) -> (i32, i32, i32) {
    %c0_i32 = arith.constant 0 : i32
    %c0_i32_0 = arith.constant 0 : i32
    %c0_i32_1 = arith.constant 0 : i32
    return %arg0, %c0_i32, %c0_i32_0 : i32, i32, i32
  }
  func.func @transform_3(%arg0: i32) -> (i32, i32) {
    %c0_i32 = arith.constant 0 : i32
    %c0_i32_0 = arith.constant 0 : i32
    %c0_i32_1 = arith.constant 0 : i32
    return %c0_i32, %c0_i32_0 : i32, i32
  }
  func.func @transform_4(%arg0: i32) -> (i32, i32) {
    %c0_i32 = arith.constant 0 : i32
    %c0_i32_0 = arith.constant 0 : i32
    %c0_i32_1 = arith.constant 0 : i32
    return %c0_i32, %c0_i32_0 : i32, i32
  }
  func.func @transform_5(%arg0: i32) -> (i32, i32) {
    %c0_i32 = arith.constant 0 : i32
    %c0_i32_0 = arith.constant 0 : i32
    return %arg0, %c0_i32 : i32, i32
  }
}

</mosaic_0001>

<bundles_post_ra>
// kernel: tpu_custom_call.1
= control target key start
LH: loop header
LB: loop body
LE: loop exit
PB: predicated region body
PF: predicated region fallthrough
CT: control target
= control target key end

     0   :  { %10 = vsyncpa [#allocation3], 0  ;;  %s857_s0 = inlined_call_operand.hbm [shape: f32[8,128], index: 0, kind: input, shape index: {}]   ;;  %s858_s1 = inlined_call_operand.hbm [shape: f32[8,8,128], index: 1, kind: input, shape index: {}]   ;;  %s859_s2 = inlined_call_operand.hbm [shape: f32[8,8,128], index: 2, kind: input, shape index: {}]   ;;  %s860_s3 = inlined_call_operand.hbm [shape: bf16[256,256], index: 3, kind: input, shape index: {}]   ;;  %s861_s4 = inlined_call_operand.vmem [shape: f32[1,256], index: 4, kind: input, shape index: {}]   ;;  %s862_s5 = inlined_call_operand.hbm [shape: f32[8,256], index: 5, kind: output, shape index: {}]  }
   0x1   :  { %11 = vsyncpa [#allocation6], 0 }
   0x2   :  { %12 = vsyncpa [#allocation9], 0  ;;  %s29_s20 = sshll.u32 %s858_s1, 4  ;;  %s30_s20 = int_to_ptr.hbm [resolvable:$true] %s29_s20 }
   0x3   :  { %13 = vsyncpa [#allocation4], 0  ;;  %s781_s21 = smov [#allocation5]   ;;  %s19_s25 = sshll.u32 %s857_s0, 4  ;;  %s20_s25 = int_to_ptr.hbm [resolvable:$true] %s19_s25 }
   0x4   :  { %s31_s22 = sshll.u32 %s781_s21, 4  ;;  %s782_s26 = smov 128   ;;  %s32_s22 = int_to_ptr.vmem [resolvable:$true] %s31_s22 }
   0x5   :  { %s783_s27 = smov 8   ;;  %s784_s28 = smov [#allocation2]  }
   0x6   :  { %37 = dma.hbm_to_vmem [thread:$0]  %s30_s20, 1024, %s32_s22, [#allocation6], %s782_s26, %s782_s26, %s783_s27  }
   0x7   :  { %s21_s29 = sshll.u32 %s784_s28, 4  ;;  %s42_s7 = sshll.u32 %s859_s2, 4  ;;  %s22_s29 = int_to_ptr.vmem [resolvable:$true] %s21_s29  ;;  %s43_s7 = int_to_ptr.hbm [resolvable:$true] %s42_s7 }
   0x8   :  { %24 = dma.hbm_to_vmem [thread:$0]  %s20_s25, 128, %s22_s29, [#allocation3]  }
   0x9   :  { %s55_s9 = sshll.u32 %s860_s3, 4  ;;  %s785_s10 = smov [#allocation7]   ;;  %s56_s9 = int_to_ptr.hbm [resolvable:$true] %s55_s9 }
   0xa   :  { %s44_s11 = sshll.u32 %s785_s10, 4  ;;  %s786_s0 = smov [#allocation8]   ;;  %s45_s11 = int_to_ptr.vmem [resolvable:$true] %s44_s11 }
   0xb   :  { %50 = dma.hbm_to_vmem [thread:$0]  %s43_s7, 1024, %s45_s11, [#allocation6], %s782_s26, %s782_s26, %s783_s27  }
   0xc   :  { %s57_s12 = sshll.u32 %s786_s0, 4  ;;  %s58_s12 = int_to_ptr.vmem [resolvable:$true] %s57_s12 }
   0xd   :  { %63 = dma.hbm_to_vmem [thread:$0]  %s56_s9, 4096, %s58_s12, [#allocation9], %s782_s26, %s782_s26, %s783_s27  }
   0xe   :  { %773 = dma.done.wait [#allocation3], 128  }
   0xf   :  { %774 = vsyncadd [#allocation3], 4294967168 }
  0x10   :  { %775 = dma.done.wait [#allocation6], 2048  }
  0x11   :  { %776 = vsyncadd [#allocation6], 4294965248 }
  0x12   :  { %777 = dma.done.wait [#allocation9], 4096  }
  0x13   :  { %778 = vsyncadd [#allocation9], 4294963200  ;;  %v542_v0 = vld [vmem:[#allocation8 + $0x70] sm:$0xf]  ;;  %v627_v1 = vld [vmem:[#allocation8 + $0x74] sm:$0xf0] }
  0x14   :  { %v606_v2 = vld [vmem:[#allocation8 + $0xf0] sm:$0xf]  ;;  %v543_v3 = vor.u32 %v627_v1, %v542_v0  ;;  %v643_v4 = vld [vmem:[#allocation8 + $0xf4] sm:$0xf0]  ;;  %v626_v5 = vld [vmem:[#allocation8 + $0x74] sm:$0xf] }
  0x15   :  { %v544_v6 = vld [vmem:[#allocation8 + $0x78] sm:$0xf0]  ;;  %v607_v7 = vor.u32 %v643_v4, %v606_v2  ;;  %v642_v9 = vld [vmem:[#allocation8 + $0xf4] sm:$0xf]  ;;  %v534_v11 = vld [vmem:[#allocation8 + $0x60] sm:$0xf] }
  0x16   :  { %v547_v8 = vor.u32 %v626_v5, %v544_v6  ;;  %v608_v10 = vld [vmem:[#allocation8 + $0xf8] sm:$0xf0]  ;;  %402 = vmatpush.bf16.msra.mxu0 %v543_v3  ;;  %v625_v13 = vld [vmem:[#allocation8 + $0x64] sm:$0xf0]  ;;  %v598_v14 = vld [vmem:[#allocation8 + $0xe0] sm:$0xf] }
  0x17   :  { %v611_v12 = vor.u32 %v642_v9, %v608_v10  ;;  %v641_v15 = vld [vmem:[#allocation8 + $0xe4] sm:$0xf0]  ;;  %415 = vmatpush.bf16.msra.mxu1 %v607_v7  ;;  %v535_v16 = vor.u32 %v625_v13, %v534_v11  ;;  %v624_v18 = vld [vmem:[#allocation8 + $0x64] sm:$0xf]  ;;  %v536_v19 = vld [vmem:[#allocation8 + $0x68] sm:$0xf0] }
  0x18   :  { %428 = vmatpush.bf16.msra.mxu2 %v547_v8  ;;  %v599_v17 = vor.u32 %v641_v15, %v598_v14  ;;  %v640_v20 = vld [vmem:[#allocation8 + $0xe4] sm:$0xf]  ;;  %v539_v21 = vor.u32 %v624_v18, %v536_v19  ;;  %v600_v22 = vld [vmem:[#allocation8 + $0xe8] sm:$0xf0]  ;;  %v526_v23 = vld [vmem:[#allocation8 + $0x50] sm:$0xf] }
  0x19   :  { %441 = vmatpush.bf16.msra.mxu3 %v611_v12  ;;  %v623_v24 = vld [vmem:[#allocation8 + $0x54] sm:$0xf0]  ;;  %v603_v25 = vor.u32 %v640_v20, %v600_v22  ;;  %v590_v26 = vld [vmem:[#allocation8 + $0xd0] sm:$0xf]  ;;  %v622_v28 = vld [vmem:[#allocation8 + $0x54] sm:$0xf] }
  0x1a   :  { %v639_v27 = vld [vmem:[#allocation8 + $0xd4] sm:$0xf0]  ;;  %403 = vmatpush.bf16.msra.mxu0 %v535_v16  ;;  %v527_v29 = vor.u32 %v623_v24, %v526_v23  ;;  %v528_v30 = vld [vmem:[#allocation8 + $0x58] sm:$0xf0]  ;;  %v638_v31 = vld [vmem:[#allocation8 + $0xd4] sm:$0xf] }
  0x1b   :  { %v592_v32 = vld [vmem:[#allocation8 + $0xd8] sm:$0xf0]  ;;  %416 = vmatpush.bf16.msra.mxu1 %v599_v17  ;;  %v591_v33 = vor.u32 %v639_v27, %v590_v26  ;;  %v531_v34 = vor.u32 %v622_v28, %v528_v30  ;;  %v518_v35 = vld [vmem:[#allocation8 + $0x40] sm:$0xf]  ;;  %v621_v36 = vld [vmem:[#allocation8 + $0x44] sm:$0xf0] }
  0x1c   :  { %429 = vmatpush.bf16.msra.mxu2 %v539_v21  ;;  %v582_v37 = vld [vmem:[#allocation8 + $0xc0] sm:$0xf]  ;;  %v595_v38 = vor.u32 %v638_v31, %v592_v32  ;;  %v637_v39 = vld [vmem:[#allocation8 + $0xc4] sm:$0xf0]  ;;  %v620_v40 = vld [vmem:[#allocation8 + $0x44] sm:$0xf]  ;;  %v519_v44 = vor.u32 %v621_v36, %v518_v35 }
  0x1d   :  { %442 = vmatpush.bf16.msra.mxu3 %v603_v25  ;;  %v520_v41 = vld [vmem:[#allocation8 + $0x48] sm:$0xf0]  ;;  %v636_v42 = vld [vmem:[#allocation8 + $0xc4] sm:$0xf]  ;;  %v510_v45 = vld [vmem:[#allocation8 + $0x30] sm:$0xf]  ;;  %v583_v46 = vor.u32 %v637_v39, %v582_v37 }
  0x1e   :  { %v584_v43 = vld [vmem:[#allocation8 + $0xc8] sm:$0xf0]  ;;  %404 = vmatpush.bf16.msra.mxu0 %v527_v29  ;;  %v523_v47 = vor.u32 %v620_v40, %v520_v41  ;;  %v619_v48 = vld [vmem:[#allocation8 + $0x34] sm:$0xf0]  ;;  %v574_v49 = vld [vmem:[#allocation8 + $0xb0] sm:$0xf] }
  0x1f   :  { %417 = vmatpush.bf16.msra.mxu1 %v591_v33  ;;  %v635_v50 = vld [vmem:[#allocation8 + $0xb4] sm:$0xf0]  ;;  %v587_v51 = vor.u32 %v636_v42, %v584_v43  ;;  %v618_v52 = vld [vmem:[#allocation8 + $0x34] sm:$0xf]  ;;  %v512_v53 = vld [vmem:[#allocation8 + $0x38] sm:$0xf0]  ;;  %v511_v58 = vor.u32 %v619_v48, %v510_v45 }
  0x20   :  { %430 = vmatpush.bf16.msra.mxu2 %v531_v34  ;;  %v634_v54 = vld [vmem:[#allocation8 + $0xb4] sm:$0xf]  ;;  %v576_v55 = vld [vmem:[#allocation8 + $0xb8] sm:$0xf0]  ;;  %v502_v56 = vld [vmem:[#allocation8 + $0x20] sm:$0xf]  ;;  %v575_v62 = vor.u32 %v635_v50, %v574_v49  ;;  %v515_v63 = vor.u32 %v618_v52, %v512_v53 }
  0x21   :  { %443 = vmatpush.bf16.msra.mxu3 %v595_v38  ;;  %v617_v57 = vld [vmem:[#allocation8 + $0x24] sm:$0xf0]  ;;  %v566_v59 = vld [vmem:[#allocation8 + $0xa0] sm:$0xf]  ;;  %v616_v61 = vld [vmem:[#allocation8 + $0x24] sm:$0xf]  ;;  %v579_v3 = vor.u32 %v634_v54, %v576_v55 }
  0x22   :  { %405 = vmatpush.bf16.msra.mxu0 %v519_v44  ;;  %v633_v60 = vld [vmem:[#allocation8 + $0xa4] sm:$0xf0]  ;;  %v504_v0 = vld [vmem:[#allocation8 + $0x28] sm:$0xf0]  ;;  %v632_v1 = vld [vmem:[#allocation8 + $0xa4] sm:$0xf]  ;;  %v503_v13 = vor.u32 %v617_v57, %v502_v56 }
  0x23   :  { %418 = vmatpush.bf16.msra.mxu1 %v583_v46  ;;  %v568_v2 = vld [vmem:[#allocation8 + $0xa8] sm:$0xf0]  ;;  %v494_v4 = vld [vmem:[#allocation8 + $0x10] sm:$0xf]  ;;  %v615_v5 = vld [vmem:[#allocation8 + $0x14] sm:$0xf0]  ;;  %v567_v17 = vor.u32 %v633_v60, %v566_v59  ;;  %v507_v18 = vor.u32 %v616_v61, %v504_v0 }
  0x24   :  { %431 = vmatpush.bf16.msra.mxu2 %v523_v47  ;;  %v558_v6 = vld [vmem:[#allocation8 + $0x90] sm:$0xf]  ;;  %v631_v7 = vld [vmem:[#allocation8 + $0x94] sm:$0xf0]  ;;  %v614_v8 = vld [vmem:[#allocation8 + $0x14] sm:$0xf]  ;;  %v571_v22 = vor.u32 %v632_v1, %v568_v2  ;;  %v495_v26 = vor.u32 %v615_v5, %v494_v4 }
  0x25   :  { %444 = vmatpush.bf16.msra.mxu3 %v587_v51  ;;  %v496_v9 = vld [vmem:[#allocation8 + $0x18] sm:$0xf0]  ;;  %v830_v10 = vld [vmem:[#allocation8 + $0x94] sm:$0xf]  ;;  %v832_v12 = vld [vmem:[#allocation8] sm:$0xf]  ;;  %v559_v27 = vor.u32 %v631_v7, %v558_v6 }
  0x26   :  { %v560_v11 = vld [vmem:[#allocation8 + $0x98] sm:$0xf0]  ;;  %406 = vmatpush.bf16.msra.mxu0 %v511_v58  ;;  %v834_v14 = vld [vmem:[#allocation8 + $0x4] sm:$0xf0]  ;;  %v836_v15 = vld [vmem:[#allocation8 + $0x80] sm:$0xf]  ;;  %v499_v31 = vor.u32 %v614_v8, %v496_v9 }
  0x27   :  { %v838_v16 = vld [vmem:[#allocation8 + $0x84] sm:$0xf0]  ;;  %419 = vmatpush.bf16.msra.mxu1 %v575_v62  ;;  %v154_v19 = vld [vmem:[#allocation2] sm:$0xff]  ;;  %v82_v20 = vld [vmem:[#allocation5] sm:$0xff]  ;;  %v563_v32 = vor.u32 %v830_v10, %v560_v11  ;;  %v487_v33 = vor.u32 %v834_v14, %v832_v12  ;;  %vm188_vm0 = vcmask 1041409   ;;  %vm190_vm1 = vcmask 1042434  }
  0x28   :  { %432 = vmatpush.bf16.msra.mxu2 %v515_v63  ;;  %v83_v21 = vld [vmem:[#allocation5 + $0x8] sm:$0xff]  ;;  %v84_v23 = vld [vmem:[#allocation5 + $0x10] sm:$0xff]  ;;  %v85_v24 = vld [vmem:[#allocation5 + $0x18] sm:$0xff]  ;;  %v551_v34 = vor.u32 %v838_v16, %v836_v15  ;;  %v845_v44 = vpack.c.bf16 %v154_v19, %v154_v19  ;;  %vm192_vm2 = vcmask 1043459   ;;  %vm194_vm3 = vcmask 1044484   ;;  %s472_s16 = sshll.u32 %s862_s5, 4  ;;  %s473_s16 = int_to_ptr.hbm [resolvable:$true] %s472_s16 }
  0x29   :  { %445 = vmatpush.bf16.msra.mxu3 %v579_v3  ;;  %v86_v25 = vld [vmem:[#allocation5 + $0x20] sm:$0xff]  ;;  %v87_v28 = vld [vmem:[#allocation5 + $0x28] sm:$0xff]  ;;  %v88_v29 = vld [vmem:[#allocation5 + $0x30] sm:$0xff]  ;;  %vm196_vm4 = vcmask 1045509   ;;  %vm198_vm5 = vcmask 1046534   ;;  %vm200_vm6 = vcmask 1047559  }
  0x2a   :  { %v89_v30 = vld [vmem:[#allocation5 + $0x38] sm:$0xff]  ;;  %407 = vmatpush.bf16.msra.mxu0 %v503_v13  ;;  %v90_v35 = vld [vmem:[#allocation7] sm:$0xff]  ;;  %v91_v36 = vld [vmem:[#allocation7 + $0x8] sm:$0xff] }
  0x2b   :  { %v92_v37 = vld [vmem:[#allocation7 + $0x10] sm:$0xff]  ;;  %420 = vmatpush.bf16.msra.mxu1 %v567_v17  ;;  %v93_v38 = vld [vmem:[#allocation7 + $0x18] sm:$0xff]  ;;  %v94_v39 = vld [vmem:[#allocation7 + $0x20] sm:$0xff]  ;;  %v98_v41 = vadd.f32 %v90_v35, %v82_v20  ;;  %v99_v42 = vadd.f32 %v91_v36, %v83_v21 }
  0x2c   :  { %433 = vmatpush.bf16.msra.mxu2 %v507_v18  ;;  %v95_v40 = vld [vmem:[#allocation7 + $0x28] sm:$0xff]  ;;  %v100_v43 = vadd.f32 %v92_v37, %v84_v23  ;;  %v96_v45 = vld [vmem:[#allocation7 + $0x30] sm:$0xff]  ;;  %v97_v46 = vld [vmem:[#allocation7 + $0x38] sm:$0xff]  ;;  %v101_v47 = vadd.f32 %v93_v38, %v85_v24  ;;  %v102_v48 = vadd.f32 %v94_v39, %v86_v25 }
  0x2d   :  { %446 = vmatpush.bf16.msra.mxu3 %v571_v22  ;;  %v103_v49 = vadd.f32 %v95_v40, %v87_v28  ;;  %v104_v50 = vadd.f32 %v96_v45, %v88_v29  ;;  %v105_v51 = vadd.f32 %v97_v46, %v89_v30  ;;  %v106_v52 = vrot.slane %v98_v41, 4 }
  0x2e   :  { %v112_v53 = vrot.slane %v99_v42, 4  ;;  %408 = vmatpush.bf16.msra.mxu0 %v495_v26  ;;  %v118_v54 = vrot.slane %v100_v43, 4  ;;  %v124_v55 = vrot.slane %v101_v47, 4  ;;  %v130_v56 = vrot.slane %v102_v48, 4 }
  0x2f   :  { %v136_v57 = vrot.slane %v103_v49, 4  ;;  %421 = vmatpush.bf16.msra.mxu1 %v559_v27  ;;  %v107_v58 = vadd.f32 %v106_v52, %v98_v41  ;;  %v142_v60 = vrot.slane %v104_v50, 4  ;;  %v148_v61 = vrot.slane %v105_v51, 4  ;;  %v488_v52 = vld [vmem:[#allocation8 + $0x8] sm:$0xf0] }
  0x30   :  { %434 = vmatpush.bf16.msra.mxu2 %v499_v31  ;;  %v113_v59 = vadd.f32 %v112_v53, %v99_v42  ;;  %v119_v62 = vadd.f32 %v118_v54, %v100_v43  ;;  %v125_v63 = vadd.f32 %v124_v55, %v101_v47  ;;  %v131_v0 = vadd.f32 %v130_v56, %v102_v48  ;;  %v612_v47 = vld [vmem:[#allocation8 + $0x4] sm:$0xf] }
  0x31   :  { %447 = vmatpush.bf16.msra.mxu3 %v563_v32  ;;  %v137_v1 = vadd.f32 %v136_v57, %v103_v49  ;;  %v108_v2 = vrot.slane %v107_v58, 2  ;;  %v143_v4 = vadd.f32 %v142_v60, %v104_v50  ;;  %v149_v5 = vadd.f32 %v148_v61, %v105_v51  ;;  %v628_v57 = vld [vmem:[#allocation8 + $0x84] sm:$0xf] }
  0x32   :  { %v114_v3 = vrot.slane %v113_v59, 2  ;;  %409 = vmatpush.bf16.msra.mxu0 %v487_v33  ;;  %v120_v6 = vrot.slane %v119_v62, 2  ;;  %v126_v7 = vrot.slane %v125_v63, 2  ;;  %v132_v8 = vrot.slane %v131_v0, 2 }
  0x33   :  { %v138_v9 = vrot.slane %v137_v1, 2  ;;  %422 = vmatpush.bf16.msra.mxu1 %v551_v34  ;;  %v109_v10 = vadd.f32 %v108_v2, %v107_v58  ;;  %v144_v12 = vrot.slane %v143_v4, 2  ;;  %v150_v13 = vrot.slane %v149_v5, 2  ;;  %v552_v58 = vld [vmem:[#allocation8 + $0x88] sm:$0xf0] }
  0x34   :  { %v115_v11 = vadd.f32 %v114_v3, %v113_v59  ;;  %v121_v14 = vadd.f32 %v120_v6, %v119_v62  ;;  %v127_v15 = vadd.f32 %v126_v7, %v125_v63  ;;  %v133_v16 = vadd.f32 %v132_v8, %v131_v0 }
  0x35   :  { %v139_v17 = vadd.f32 %v138_v9, %v137_v1  ;;  %410 = vmatmul.bf16.vlgmr.msra.gmra.mxu0 %v845_v44  ;;  %v110_v18 = vrot.slane %v109_v10, 1  ;;  %v145_v20 = vadd.f32 %v144_v12, %v143_v4  ;;  %v151_v21 = vadd.f32 %v150_v13, %v149_v5  ;;  %v236_v13 = vld [vmem:[%s861_s4] sm:$0x3]  ;;  %s787_s4 = smov [#allocation10]  }
  0x36   :  { %v116_v19 = vrot.slane %v115_v11, 1  ;;  %v122_v22 = vrot.slane %v121_v14, 1  ;;  %v128_v23 = vrot.slane %v127_v15, 1  ;;  %v134_v24 = vrot.slane %v133_v16, 1  ;;  %s470_s13 = sshll.u32 %s787_s4, 4  ;;  %s471_s13 = int_to_ptr.vmem [resolvable:$true] %s470_s13 }
  0x37   :  { %v140_v25 = vrot.slane %v139_v17, 1  ;;  %v111_v26 = vadd.f32 %v110_v18, %v109_v10  ;;  %v146_v28 = vrot.slane %v145_v20, 1  ;;  %v152_v29 = vrot.slane %v151_v21, 1 }
  0x38   :  { %v117_v27 = vadd.f32 %v116_v19, %v115_v11  ;;  %v123_v30 = vadd.f32 %v122_v22, %v121_v14  ;;  %v129_v31 = vadd.f32 %v128_v23, %v127_v15  ;;  %v135_v32 = vadd.f32 %v134_v24, %v133_v16 }
  0x39   :  { %v141_v33 = vadd.f32 %v140_v25, %v139_v17  ;;  %v147_v34 = vadd.f32 %v146_v28, %v145_v20  ;;  %v153_v35 = vadd.f32 %v152_v29, %v151_v21  ;;  %v156_v36 = vpack.c.bf16 %v111_v26, %v111_v26 }
  0x3a   :  { %v157_v37 = vpack.c.bf16 %v117_v27, %v117_v27  ;;  %v158_v38 = vpack.c.bf16 %v123_v30, %v123_v30  ;;  %v159_v39 = vpack.c.bf16 %v129_v31, %v129_v31  ;;  %v160_v40 = vpack.c.bf16 %v135_v32, %v135_v32 }
  0x3b   :  { %v161_v41 = vpack.c.bf16 %v141_v33, %v141_v33  ;;  %v162_v42 = vpack.c.bf16 %v147_v34, %v147_v34  ;;  %v163_v43 = vpack.c.bf16 %v153_v35, %v153_v35  ;;  %v172_v45 = vperm.slane %v156_v36, 0 }
  0x3c   :  { %v173_v46 = vperm.slane %v157_v37, 0  ;;  %v174_v48 = vperm.slane %v158_v38, 0  ;;  %v175_v49 = vperm.slane %v159_v39, 0  ;;  %v176_v50 = vperm.slane %v160_v40, 0 }
  0x3d   :  { %v177_v51 = vperm.slane %v161_v41, 0  ;;  %v178_v53 = vperm.slane %v162_v42, 0  ;;  %v179_v54 = vperm.slane %v163_v43, 0  ;;  %v180_v55 = vunpack.c.l.b16 %v172_v45 }
  0x3e   :  { %v181_v56 = vunpack.c.l.b16 %v173_v46  ;;  %v182_v59 = vunpack.c.l.b16 %v174_v48  ;;  %v183_v60 = vunpack.c.l.b16 %v175_v49  ;;  %v184_v61 = vunpack.c.l.b16 %v176_v50 }
  0x3f   :  { %v185_v62 = vunpack.c.l.b16 %v177_v51  ;;  %v491_v0 = vor.u32 %v612_v47, %v488_v52  ;;  %v186_v1 = vunpack.c.l.b16 %v178_v53  ;;  %v555_v3 = vor.u32 %v628_v57, %v552_v58 }
  0x40   :  { %v189_v63 = vsel %vm188_vm0, %v181_v56, %v180_v55  ;;  %v187_v4 = vunpack.c.l.b16 %v179_v54  ;;  %v238_v14 = vperm.slane %v236_v13, 0  ;;  %v239_v16 = vperm.slane %v236_v13, 1 }
  0x41   :  { %v191_v2 = vsel %vm190_vm1, %v182_v59, %v189_v63  ;;  %435 = vmatpush.bf16.msra.mxu2 %v491_v0  ;;  %448 = vmatpush.bf16.msra.mxu3 %v555_v3 }
  0x42   :  { %v193_v5 = vsel %vm192_vm2, %v183_v60, %v191_v2 }
  0x43   :  { %v195_v6 = vsel %vm194_vm3, %v184_v61, %v193_v5 }
  0x44   :  { %v197_v7 = vsel %vm196_vm4, %v185_v62, %v195_v6  ;;  %436 = vmatmul.bf16.vlgmr.msra.gmra.mxu2 %v845_v44 }
  0x45   :  { %v199_v8 = vsel %vm198_vm5, %v186_v1, %v197_v7 }
  0x46   :  { %v201_v9 = vsel %vm200_vm6, %v187_v4, %v199_v8 }
  0x47   :  { %v202_v10 = vpack.c.b16 %v201_v9, %v201_v9 }
  0x49   :  { %423 = vmatmul.bf16.vlgmr.msra.gmra.mxu1 %v202_v10  ;;  %449 = vmatmul.bf16.vlgmr.msra.gmra.mxu3 %v202_v10 }
  0xb2   :  { %v411_v11 = vpop.f32.mrf.mxu0 }
  0xb3   :  { %v412_v15 = vadd.f32 %v411_v11, %v238_v14 }
  0xba   :  { %v413_v12 = vpop.f32.mrf.mxu0 }
  0xc6   :  { %v424_v17 = vpop.f32.mrf.mxu1 }
  0xc7   :  { %v425_v18 = vadd.f32 %v424_v17, %v412_v15  ;;  %v437_v19 = vpop.f32.mrf.mxu2 }
  0xc8   :  { %v438_v21 = vadd.f32 %v437_v19, %v239_v16 }
  0xc9   :  { %v455_v20 = vmul.f32 0.035677407, %v425_v18  ;;  %v454_v31 = vmul.f32 0.5, %v425_v18 }
  0xcb   :  { %v456_v22 = vmul.f32 %v455_v20, %v425_v18 }
  0xcc   :  { %v450_v44 = vpop.f32.mrf.mxu3 }
  0xcd   :  { %v457_v23 = vadd.f32 0.7978846, %v456_v22  ;;  %v451_v24 = vadd.f32 %v450_v44, %v438_v21 }
  0xce   :  { %v426_v25 = vpop.f32.mrf.mxu1 }
  0xcf   :  { %v458_v26 = vmul.f32 %v457_v23, %v425_v18  ;;  %v463_v27 = vmax.f32 %v451_v24, 0.0  ;;  %v439_v28 = vpop.f32.mrf.mxu2 }
  0xd1   :  { %651 = vtanh.f32 %v458_v26  ;;  %464 = vst [vmem:[#allocation10 + $0x8] sm:$0xff] %v463_v27 }
  0xd4   :  { %v452_v29 = vpop.f32.mrf.mxu3 }
  0xd7   :  { %v652_v30 = vpop.eup %651 }
  0xd8   :  { %v460_v32 = vadd.f32 1.0, %v652_v30 }
  0xda   :  { %v461_v33 = vmul.f32 %v460_v32, %v454_v31 }
  0xdc   :  { %462 = vst [vmem:[#allocation10] sm:$0xff] %v461_v33 }
  0xdd   :  { %475 = dma.vmem_to_hbm [thread:$0]  %s471_s13, 256, %s473_s16, [#allocation4]  }
  0xde   :  { %779 = dma.done.wait [#allocation4], 256  }
  0xdf   :  { %780 = vsyncadd [#allocation4], 4294967040 }
  0xe0   :  { %480 = vsyncpa [#allocation3], 1 }
  0xe1   :  { %481 = vsyncpa [#allocation6], 1 }
  0xe2   :  { %482 = vsyncpa [#allocation9], 1 }
  0xe3   :  { %483 = vsyncpa [#allocation4], 1 }

</bundles_post_ra>
